<compile_context>
chip_gen: v6e
topology: v6e:2x2x1
jax: 0.10.0
libtpu: 0.0.40
codegen_flags: <defaults>
</compile_context>

<pallas_src>
import functools

import jax
import jax.numpy as jnp
from jax.experimental import pallas as pl
from jax.experimental.pallas import tpu as pltpu

LANE = 128


def _label_mix_kernel(bits_ref, wimg_ref, wseg_ref, b_ref,
                      seg_ref, real_ref, gen_ref, rdisc_ref, gdisc_ref,
                      out_ref, *, true_p):
    p = pl.program_id(1)

    c_seg = seg_ref.shape[1]
    c_img = real_ref.shape[1]
    ts, lanes = seg_ref.shape[2], seg_ref.shape[3]

    # Fused argmax (first-index tie-break, like torch) + per-class {0,1}
    # relabel + seg-channel dot.  One running scan over channels keeps only a
    # few live (TS,128) f32 vreg chains; inputs are cast per channel so no
    # (Cseg,TS,128) f32 copy is ever materialized.
    # (All-NaN pixel columns yield m=bits[0*? ] -> same as torch argmax=0 only
    #  if no comparison fires; strict '>' never fires on NaN, so m=bits[0].)
    seg_c = seg_ref[0, 0].astype(jnp.float32)
    best = seg_c
    m = jnp.full((ts, lanes), bits_ref[0], jnp.float32)
    s_dot = wseg_ref[0] * seg_c
    for c in range(1, c_seg):
        seg_c = seg_ref[0, c].astype(jnp.float32)
        gt = seg_c > best
        best = jnp.where(gt, seg_c, best)
        m = jnp.where(gt, bits_ref[c], m)
        s_dot = s_dot + wseg_ref[c] * seg_c

    # TODO(synk): self.discriminator is never defined in __init__ (injected
    # externally in the original codebase); a deterministic 1x1-conv patch
    # discriminator over [mixed_image ; seg] channels is used as a stand-in.
    # The 1x1 conv is distributed through the mix so the (Cimg,TS,128)
    # `mixed_image` temporary is never materialized:
    #   disc = g_dot + m*(r_dot - g_dot) + s_dot + b
    r_dot = wimg_ref[0] * real_ref[0, 0].astype(jnp.float32)
    g_dot = wimg_ref[0] * gen_ref[0, 0].astype(jnp.float32)
    for c in range(1, c_img):
        r_dot = r_dot + wimg_ref[c] * real_ref[0, c].astype(jnp.float32)
        g_dot = g_dot + wimg_ref[c] * gen_ref[0, c].astype(jnp.float32)

    rdisc = rdisc_ref[0, 0].astype(jnp.float32)
    gdisc = gdisc_ref[0, 0].astype(jnp.float32)

    disc = g_dot + m * (r_dot - g_dot) + s_dot + b_ref[0]
    mixed_d = gdisc + m * (rdisc - gdisc)
    diff = disc - mixed_d
    sq = diff * diff

    def _reduce(x):
        # (TS,128) -> (TS//8, 8, 128) -> sum over vreg groups -> one (8,128) vreg.
        return jnp.sum(x.reshape(ts // 8, 8, lanes), axis=0)

    out_ref[0, 0] = _reduce(sq)

    if true_p is not None:
        # Wrapper padding only lives on the last pixel tile; pay the mask there.
        @pl.when(p == pl.num_programs(1) - 1)
        def _():
            sub = jax.lax.broadcasted_iota(jnp.int32, (ts, lanes), 0)
            lane = jax.lax.broadcasted_iota(jnp.int32, (ts, lanes), 1)
            pix = (p * ts + sub) * lanes + lane
            out_ref[0, 0] = _reduce(jnp.where(pix < true_p, sq, 0.0))


def label_mix_reg(real_images, generated_images, segmentation_maps,
                  real_disc, generated_disc, class_bits, disc_w, disc_b,
                  *, vmem_budget_bytes=24 * 1024 * 1024):
    """All image-like inputs are NCHW; they may be bf16 (DMA'd in native dtype)."""
    N, Cimg, H, W = real_images.shape
    Cseg = segmentation_maps.shape[1]
    P = H * W
    S = pl.cdiv(P, LANE)                       # sublane rows of 128 lanes

    # Pixel-tile rows (TS) sized from a VMEM byte budget: double-buffered
    # native-dtype input tiles + ~10 live f32 (TS,128) temporaries.  Capped at
    # 1024 rows (gains plateau) and kept a multiple of 16 (bf16 sublane pack).
    itemsize = lambda a: jnp.dtype(a.dtype).itemsize
    bytes_per_row = LANE * (
        2 * (Cseg * itemsize(segmentation_maps)
             + Cimg * (itemsize(real_images) + itemsize(generated_images))
             + itemsize(real_disc) + itemsize(generated_disc))
        + 10 * 4)
    ts_cap = int(vmem_budget_bytes // bytes_per_row)
    ts_cap = max(16, min(1024, (ts_cap // 16) * 16))

    S16 = pl.cdiv(S, 16) * 16
    TS = ts_cap if S16 > ts_cap else S16
    S_pad = pl.cdiv(S, TS) * TS
    P_pad = S_pad * LANE
    n_ptiles = S_pad // TS

    def prep(x, c):
        x = x.reshape(N, c, P)
        if P_pad != P:
            x = jnp.pad(x, ((0, 0), (0, 0), (0, P_pad - P)))
        return x.reshape(N, c, S_pad, LANE)

    seg = prep(segmentation_maps, Cseg)
    real = prep(real_images, Cimg)
    gen = prep(generated_images, Cimg)
    rdisc = prep(real_disc, 1)
    gdisc = prep(generated_disc, 1)

    bits = class_bits.reshape(Cseg).astype(jnp.float32)
    w = disc_w.reshape(Cimg + Cseg).astype(jnp.float32)
    w_img, w_seg = w[:Cimg], w[Cimg:]
    b = disc_b.reshape(1).astype(jnp.float32)

    kernel = functools.partial(_label_mix_kernel,
                               true_p=P if P_pad != P else None)
    smem = pl.BlockSpec(memory_space=pltpu.MemorySpace.SMEM)

    partials = pl.pallas_call(
        kernel,
        out_shape=jax.ShapeDtypeStruct((N, n_ptiles, 8, LANE), jnp.float32),
        grid_spec=pltpu.PrefetchScalarGridSpec(
            num_scalar_prefetch=0,
            grid=(N, n_ptiles),
            in_specs=[
                smem,                                                  # class bits
                smem,                                                  # w_img
                smem,                                                  # w_seg
                smem,                                                  # bias
                pl.BlockSpec((1, Cseg, TS, LANE), lambda n, p: (n, 0, p, 0)),
                pl.BlockSpec((1, Cimg, TS, LANE), lambda n, p: (n, 0, p, 0)),
                pl.BlockSpec((1, Cimg, TS, LANE), lambda n, p: (n, 0, p, 0)),
                pl.BlockSpec((1, 1, TS, LANE), lambda n, p: (n, 0, p, 0)),
                pl.BlockSpec((1, 1, TS, LANE), lambda n, p: (n, 0, p, 0)),
            ],
            out_specs=pl.BlockSpec((1, 1, 8, LANE), lambda n, p: (n, p, 0, 0)),
        ),
        compiler_params=pltpu.CompilerParams(
            dimension_semantics=("parallel", "parallel"),
            vmem_limit_bytes=48 * 1024 * 1024),
    )(bits, w_img, w_seg, b, seg, real, gen, rdisc, gdisc)

    # MSELoss default reduction='mean' over all N*1*H*W discriminator elements.
    return jnp.sum(partials) / jnp.float32(N * P)


if __name__ == "__main__":
    key = jax.random.PRNGKey(0)
    ks = jax.random.split(key, 8)

    N, Cimg, Cseg, H, W = 2, 3, 5, 16, 16

    # Big image-like tensors in bf16: DMA'd at half the HBM bytes, cast in-kernel.
    real_images = jax.random.normal(ks[0], (N, Cimg, H, W), jnp.bfloat16)
    generated_images = jax.random.normal(ks[1], (N, Cimg, H, W), jnp.bfloat16)
    segmentation_maps = jax.random.normal(ks[2], (N, Cseg, H, W), jnp.bfloat16)
    real_disc = jax.random.normal(ks[3], (N, 1, H, W), jnp.bfloat16)
    generated_disc = jax.random.normal(ks[4], (N, 1, H, W), jnp.bfloat16)

    # torch.randint(0, 2, (1,)) per class -> deterministic per-class bits here
    # (must be re-drawn per forward call by the caller to match torch).
    class_bits = jax.random.randint(ks[5], (Cseg,), 0, 2).astype(jnp.float32)
    # Stand-in discriminator parameters (1x1 conv over Cimg+Cseg channels -> 1).
    disc_w = 0.1 * jax.random.normal(ks[6], (Cimg + Cseg,), jnp.float32)
    disc_b = jnp.zeros((1,), jnp.float32)

    loss = label_mix_reg(real_images, generated_images, segmentation_maps,
                         real_disc, generated_disc, class_bits, disc_w, disc_b)
    jax.block_until_ready(loss)
    print("KERNEL_OK")
</pallas_src>

<mosaic_0001>
module attributes {stable_mosaic.version = 11 : i64} {
  func.func @_label_mix_kernel(%arg0: i32, %arg1: i32, %arg2: memref<5xf32, #tpu.memory_space<smem>>, %arg3: memref<3xf32, #tpu.memory_space<smem>>, %arg4: memref<5xf32, #tpu.memory_space<smem>>, %arg5: memref<1xf32, #tpu.memory_space<smem>>, %arg6: memref<1x5x16x128xbf16, #tpu.memory_space<vmem>>, %arg7: memref<1x3x16x128xbf16, #tpu.memory_space<vmem>>, %arg8: memref<1x3x16x128xbf16, #tpu.memory_space<vmem>>, %arg9: memref<1x1x16x128xbf16, #tpu.memory_space<vmem>>, %arg10: memref<1x1x16x128xbf16, #tpu.memory_space<vmem>>, %arg11: memref<1x1x8x128xf32, #tpu.memory_space<vmem>>) attributes {dimension_semantics = [#tpu.dimension_semantics<parallel>, #tpu.dimension_semantics<parallel>], iteration_bounds = array<i64: 2, 1>, scalar_prefetch = 0 : i64, scratch_operands = 0 : i64, tpu.core_type = #tpu.core_type<tc>, window_params = [{transform_indices = @transform_0, window_bounds = array<i64: 5>}, {transform_indices = @transform_1, window_bounds = array<i64: 3>}, {transform_indices = @transform_2, window_bounds = array<i64: 5>}, {transform_indices = @transform_3, window_bounds = array<i64: 1>}, {transform_indices = @transform_4, window_bounds = array<i64: 1, 5, 16, 128>}, {transform_indices = @transform_5, window_bounds = array<i64: 1, 3, 16, 128>}, {transform_indices = @transform_6, window_bounds = array<i64: 1, 3, 16, 128>}, {transform_indices = @transform_7, window_bounds = array<i64: 1, 1, 16, 128>}, {transform_indices = @transform_8, window_bounds = array<i64: 1, 1, 16, 128>}, {transform_indices = @transform_9, window_bounds = array<i64: 1, 1, 8, 128>}]} {
    %c0 = arith.constant 0 : index
    %c0_0 = arith.constant 0 : index
    %c0_1 = arith.constant 0 : index
    %c0_2 = arith.constant 0 : index
    %0 = vector.load %arg6[%c0, %c0_0, %c0_1, %c0_2] : memref<1x5x16x128xbf16, #tpu.memory_space<vmem>>, vector<1x1x16x128xbf16>
    %1 = vector.shape_cast %0 : vector<1x1x16x128xbf16> to vector<16x128xbf16>
    %2 = arith.extf %1 : vector<16x128xbf16> to vector<16x128xf32>
    %c0_3 = arith.constant 0 : index
    %3 = memref.load %arg2[%c0_3] : memref<5xf32, #tpu.memory_space<smem>>
    %4 = vector.broadcast %3 : f32 to vector<16x128xf32>
    %c0_4 = arith.constant 0 : index
    %5 = memref.load %arg4[%c0_4] : memref<5xf32, #tpu.memory_space<smem>>
    %6 = vector.broadcast %5 : f32 to vector<16x128xf32>
    %7 = arith.mulf %6, %2 : vector<16x128xf32>
    %c0_5 = arith.constant 0 : index
    %c1 = arith.constant 1 : index
    %c0_6 = arith.constant 0 : index
    %c0_7 = arith.constant 0 : index
    %8 = vector.load %arg6[%c0_5, %c1, %c0_6, %c0_7] : memref<1x5x16x128xbf16, #tpu.memory_space<vmem>>, vector<1x1x16x128xbf16>
    %9 = vector.shape_cast %8 : vector<1x1x16x128xbf16> to vector<16x128xbf16>
    %10 = arith.extf %9 : vector<16x128xbf16> to vector<16x128xf32>
    %11 = arith.cmpf ogt, %10, %2 : vector<16x128xf32>
    %12 = arith.select %11, %10, %2 : vector<16x128xi1>, vector<16x128xf32>
    %c1_8 = arith.constant 1 : index
    %13 = memref.load %arg2[%c1_8] : memref<5xf32, #tpu.memory_space<smem>>
    %14 = vector.broadcast %13 : f32 to vector<16x128xf32>
    %15 = arith.select %11, %14, %4 : vector<16x128xi1>, vector<16x128xf32>
    %c1_9 = arith.constant 1 : index
    %16 = memref.load %arg4[%c1_9] : memref<5xf32, #tpu.memory_space<smem>>
    %17 = vector.broadcast %16 : f32 to vector<16x128xf32>
    %18 = arith.mulf %17, %10 : vector<16x128xf32>
    %19 = arith.addf %7, %18 : vector<16x128xf32>
    %c0_10 = arith.constant 0 : index
    %c2 = arith.constant 2 : index
    %c0_11 = arith.constant 0 : index
    %c0_12 = arith.constant 0 : index
    %20 = vector.load %arg6[%c0_10, %c2, %c0_11, %c0_12] : memref<1x5x16x128xbf16, #tpu.memory_space<vmem>>, vector<1x1x16x128xbf16>
    %21 = vector.shape_cast %20 : vector<1x1x16x128xbf16> to vector<16x128xbf16>
    %22 = arith.extf %21 : vector<16x128xbf16> to vector<16x128xf32>
    %23 = arith.cmpf ogt, %22, %12 : vector<16x128xf32>
    %24 = arith.select %23, %22, %12 : vector<16x128xi1>, vector<16x128xf32>
    %c2_13 = arith.constant 2 : index
    %25 = memref.load %arg2[%c2_13] : memref<5xf32, #tpu.memory_space<smem>>
    %26 = vector.broadcast %25 : f32 to vector<16x128xf32>
    %27 = arith.select %23, %26, %15 : vector<16x128xi1>, vector<16x128xf32>
    %c2_14 = arith.constant 2 : index
    %28 = memref.load %arg4[%c2_14] : memref<5xf32, #tpu.memory_space<smem>>
    %29 = vector.broadcast %28 : f32 to vector<16x128xf32>
    %30 = arith.mulf %29, %22 : vector<16x128xf32>
    %31 = arith.addf %19, %30 : vector<16x128xf32>
    %c0_15 = arith.constant 0 : index
    %c3 = arith.constant 3 : index
    %c0_16 = arith.constant 0 : index
    %c0_17 = arith.constant 0 : index
    %32 = vector.load %arg6[%c0_15, %c3, %c0_16, %c0_17] : memref<1x5x16x128xbf16, #tpu.memory_space<vmem>>, vector<1x1x16x128xbf16>
    %33 = vector.shape_cast %32 : vector<1x1x16x128xbf16> to vector<16x128xbf16>
    %34 = arith.extf %33 : vector<16x128xbf16> to vector<16x128xf32>
    %35 = arith.cmpf ogt, %34, %24 : vector<16x128xf32>
    %36 = arith.select %35, %34, %24 : vector<16x128xi1>, vector<16x128xf32>
    %c3_18 = arith.constant 3 : index
    %37 = memref.load %arg2[%c3_18] : memref<5xf32, #tpu.memory_space<smem>>
    %38 = vector.broadcast %37 : f32 to vector<16x128xf32>
    %39 = arith.select %35, %38, %27 : vector<16x128xi1>, vector<16x128xf32>
    %c3_19 = arith.constant 3 : index
    %40 = memref.load %arg4[%c3_19] : memref<5xf32, #tpu.memory_space<smem>>
    %41 = vector.broadcast %40 : f32 to vector<16x128xf32>
    %42 = arith.mulf %41, %34 : vector<16x128xf32>
    %43 = arith.addf %31, %42 : vector<16x128xf32>
    %c0_20 = arith.constant 0 : index
    %c4 = arith.constant 4 : index
    %c0_21 = arith.constant 0 : index
    %c0_22 = arith.constant 0 : index
    %44 = vector.load %arg6[%c0_20, %c4, %c0_21, %c0_22] : memref<1x5x16x128xbf16, #tpu.memory_space<vmem>>, vector<1x1x16x128xbf16>
    %45 = vector.shape_cast %44 : vector<1x1x16x128xbf16> to vector<16x128xbf16>
    %46 = arith.extf %45 : vector<16x128xbf16> to vector<16x128xf32>
    %47 = arith.cmpf ogt, %46, %36 : vector<16x128xf32>
    %c4_23 = arith.constant 4 : index
    %48 = memref.load %arg2[%c4_23] : memref<5xf32, #tpu.memory_space<smem>>
    %49 = vector.broadcast %48 : f32 to vector<16x128xf32>
    %50 = arith.select %47, %49, %39 : vector<16x128xi1>, vector<16x128xf32>
    %c4_24 = arith.constant 4 : index
    %51 = memref.load %arg4[%c4_24] : memref<5xf32, #tpu.memory_space<smem>>
    %52 = vector.broadcast %51 : f32 to vector<16x128xf32>
    %53 = arith.mulf %52, %46 : vector<16x128xf32>
    %54 = arith.addf %43, %53 : vector<16x128xf32>
    %c0_25 = arith.constant 0 : index
    %55 = memref.load %arg3[%c0_25] : memref<3xf32, #tpu.memory_space<smem>>
    %c0_26 = arith.constant 0 : index
    %c0_27 = arith.constant 0 : index
    %c0_28 = arith.constant 0 : index
    %c0_29 = arith.constant 0 : index
    %56 = vector.load %arg7[%c0_26, %c0_27, %c0_28, %c0_29] : memref<1x3x16x128xbf16, #tpu.memory_space<vmem>>, vector<1x1x16x128xbf16>
    %57 = vector.shape_cast %56 : vector<1x1x16x128xbf16> to vector<16x128xbf16>
    %58 = arith.extf %57 : vector<16x128xbf16> to vector<16x128xf32>
    %59 = vector.broadcast %55 : f32 to vector<16x128xf32>
    %60 = arith.mulf %59, %58 : vector<16x128xf32>
    %c0_30 = arith.constant 0 : index
    %61 = memref.load %arg3[%c0_30] : memref<3xf32, #tpu.memory_space<smem>>
    %c0_31 = arith.constant 0 : index
    %c0_32 = arith.constant 0 : index
    %c0_33 = arith.constant 0 : index
    %c0_34 = arith.constant 0 : index
    %62 = vector.load %arg8[%c0_31, %c0_32, %c0_33, %c0_34] : memref<1x3x16x128xbf16, #tpu.memory_space<vmem>>, vector<1x1x16x128xbf16>
    %63 = vector.shape_cast %62 : vector<1x1x16x128xbf16> to vector<16x128xbf16>
    %64 = arith.extf %63 : vector<16x128xbf16> to vector<16x128xf32>
    %65 = vector.broadcast %61 : f32 to vector<16x128xf32>
    %66 = arith.mulf %65, %64 : vector<16x128xf32>
    %c1_35 = arith.constant 1 : index
    %67 = memref.load %arg3[%c1_35] : memref<3xf32, #tpu.memory_space<smem>>
    %c0_36 = arith.constant 0 : index
    %c1_37 = arith.constant 1 : index
    %c0_38 = arith.constant 0 : index
    %c0_39 = arith.constant 0 : index
    %68 = vector.load %arg7[%c0_36, %c1_37, %c0_38, %c0_39] : memref<1x3x16x128xbf16, #tpu.memory_space<vmem>>, vector<1x1x16x128xbf16>
    %69 = vector.shape_cast %68 : vector<1x1x16x128xbf16> to vector<16x128xbf16>
    %70 = arith.extf %69 : vector<16x128xbf16> to vector<16x128xf32>
    %71 = vector.broadcast %67 : f32 to vector<16x128xf32>
    %72 = arith.mulf %71, %70 : vector<16x128xf32>
    %73 = arith.addf %60, %72 : vector<16x128xf32>
    %c1_40 = arith.constant 1 : index
    %74 = memref.load %arg3[%c1_40] : memref<3xf32, #tpu.memory_space<smem>>
    %c0_41 = arith.constant 0 : index
    %c1_42 = arith.constant 1 : index
    %c0_43 = arith.constant 0 : index
    %c0_44 = arith.constant 0 : index
    %75 = vector.load %arg8[%c0_41, %c1_42, %c0_43, %c0_44] : memref<1x3x16x128xbf16, #tpu.memory_space<vmem>>, vector<1x1x16x128xbf16>
    %76 = vector.shape_cast %75 : vector<1x1x16x128xbf16> to vector<16x128xbf16>
    %77 = arith.extf %76 : vector<16x128xbf16> to vector<16x128xf32>
    %78 = vector.broadcast %74 : f32 to vector<16x128xf32>
    %79 = arith.mulf %78, %77 : vector<16x128xf32>
    %80 = arith.addf %66, %79 : vector<16x128xf32>
    %c2_45 = arith.constant 2 : index
    %81 = memref.load %arg3[%c2_45] : memref<3xf32, #tpu.memory_space<smem>>
    %c0_46 = arith.constant 0 : index
    %c2_47 = arith.constant 2 : index
    %c0_48 = arith.constant 0 : index
    %c0_49 = arith.constant 0 : index
    %82 = vector.load %arg7[%c0_46, %c2_47, %c0_48, %c0_49] : memref<1x3x16x128xbf16, #tpu.memory_space<vmem>>, vector<1x1x16x128xbf16>
    %83 = vector.shape_cast %82 : vector<1x1x16x128xbf16> to vector<16x128xbf16>
    %84 = arith.extf %83 : vector<16x128xbf16> to vector<16x128xf32>
    %85 = vector.broadcast %81 : f32 to vector<16x128xf32>
    %86 = arith.mulf %85, %84 : vector<16x128xf32>
    %87 = arith.addf %73, %86 : vector<16x128xf32>
    %c2_50 = arith.constant 2 : index
    %88 = memref.load %arg3[%c2_50] : memref<3xf32, #tpu.memory_space<smem>>
    %c0_51 = arith.constant 0 : index
    %c2_52 = arith.constant 2 : index
    %c0_53 = arith.constant 0 : index
    %c0_54 = arith.constant 0 : index
    %89 = vector.load %arg8[%c0_51, %c2_52, %c0_53, %c0_54] : memref<1x3x16x128xbf16, #tpu.memory_space<vmem>>, vector<1x1x16x128xbf16>
    %90 = vector.shape_cast %89 : vector<1x1x16x128xbf16> to vector<16x128xbf16>
    %91 = arith.extf %90 : vector<16x128xbf16> to vector<16x128xf32>
    %92 = vector.broadcast %88 : f32 to vector<16x128xf32>
    %93 = arith.mulf %92, %91 : vector<16x128xf32>
    %94 = arith.addf %80, %93 : vector<16x128xf32>
    %c0_55 = arith.constant 0 : index
    %c0_56 = arith.constant 0 : index
    %c0_57 = arith.constant 0 : index
    %c0_58 = arith.constant 0 : index
    %95 = vector.load %arg9[%c0_55, %c0_56, %c0_57, %c0_58] : memref<1x1x16x128xbf16, #tpu.memory_space<vmem>>, vector<1x1x16x128xbf16>
    %96 = vector.shape_cast %95 : vector<1x1x16x128xbf16> to vector<16x128xbf16>
    %97 = arith.extf %96 : vector<16x128xbf16> to vector<16x128xf32>
    %c0_59 = arith.constant 0 : index
    %c0_60 = arith.constant 0 : index
    %c0_61 = arith.constant 0 : index
    %c0_62 = arith.constant 0 : index
    %98 = vector.load %arg10[%c0_59, %c0_60, %c0_61, %c0_62] : memref<1x1x16x128xbf16, #tpu.memory_space<vmem>>, vector<1x1x16x128xbf16>
    %99 = vector.shape_cast %98 : vector<1x1x16x128xbf16> to vector<16x128xbf16>
    %100 = arith.extf %99 : vector<16x128xbf16> to vector<16x128xf32>
    %101 = arith.subf %87, %94 : vector<16x128xf32>
    %102 = arith.mulf %50, %101 : vector<16x128xf32>
    %103 = arith.addf %94, %102 : vector<16x128xf32>
    %104 = arith.addf %103, %54 : vector<16x128xf32>
    %c0_63 = arith.constant 0 : index
    %105 = memref.load %arg5[%c0_63] : memref<1xf32, #tpu.memory_space<smem>>
    %106 = vector.broadcast %105 : f32 to vector<16x128xf32>
    %107 = arith.addf %104, %106 : vector<16x128xf32>
    %108 = arith.subf %97, %100 : vector<16x128xf32>
    %109 = arith.mulf %50, %108 : vector<16x128xf32>
    %110 = arith.addf %100, %109 : vector<16x128xf32>
    %111 = arith.subf %107, %110 : vector<16x128xf32>
    %112 = arith.mulf %111, %111 : vector<16x128xf32>
    %113 = vector.shape_cast %112 : vector<16x128xf32> to vector<2x8x128xf32>
    %cst = arith.constant dense<0.000000e+00> : vector<8x128xf32>
    %114 = vector.multi_reduction <add>, %113, %cst [0] : vector<2x8x128xf32> to vector<8x128xf32>
    %c0_64 = arith.constant 0 : index
    %c0_65 = arith.constant 0 : index
    %c0_66 = arith.constant 0 : index
    %c0_67 = arith.constant 0 : index
    %115 = vector.load %arg11[%c0_64, %c0_65, %c0_66, %c0_67] : memref<1x1x8x128xf32, #tpu.memory_space<vmem>>, vector<1x1x8x128xf32>
    %116 = vector.shape_cast %115 : vector<1x1x8x128xf32> to vector<8x128xf32>
    %117 = vector.shape_cast %114 : vector<8x128xf32> to vector<1x1x8x128xf32>
    tpu.vector_store %arg11[%c0_64, %c0_65, %c0_66, %c0_67], %117 {strides = array<i32>} : memref<1x1x8x128xf32, #tpu.memory_space<vmem>>, vector<1x1x8x128xf32>,
    %c0_i32 = arith.constant 0 : i32
    %118 = arith.cmpi eq, %arg1, %c0_i32 : i32
    %119 = arith.extui %118 : i1 to i32
    %c0_i32_68 = arith.constant 0 : i32
    %120 = arith.cmpi ne, %119, %c0_i32_68 : i32
    scf.if %120 {
      %121 = tpu.iota {dimensions = array<i32: 0>} : vector<16x128xi32>
      %122 = tpu.iota {dimensions = array<i32: 1>} : vector<16x128xi32>
      %c16_i32 = arith.constant 16 : i32
      %123 = arith.muli %arg1, %c16_i32 : i32
      %124 = vector.broadcast %123 : i32 to vector<16x128xi32>
      %125 = arith.addi %124, %121 : vector<16x128xi32>
      %c128_i32 = arith.constant 128 : i32
      %126 = vector.broadcast %c128_i32 : i32 to vector<16x128xi32>
      %127 = arith.muli %125, %126 : vector<16x128xi32>
      %128 = arith.addi %127, %122 : vector<16x128xi32>
      %c256_i32 = arith.constant 256 : i32
      %129 = vector.broadcast %c256_i32 : i32 to vector<16x128xi32>
      %130 = arith.cmpi slt, %128, %129 : vector<16x128xi32>
      %cst_69 = arith.constant 0.000000e+00 : f32
      %131 = vector.broadcast %cst_69 : f32 to vector<16x128xf32>
      %132 = arith.select %130, %112, %131 : vector<16x128xi1>, vector<16x128xf32>
      %133 = vector.shape_cast %132 : vector<16x128xf32> to vector<2x8x128xf32>
      %cst_70 = arith.constant dense<0.000000e+00> : vector<8x128xf32>
      %134 = vector.multi_reduction <add>, %133, %cst_70 [0] : vector<2x8x128xf32> to vector<8x128xf32>
      %c0_71 = arith.constant 0 : index
      %c0_72 = arith.constant 0 : index
      %c0_73 = arith.constant 0 : index
      %c0_74 = arith.constant 0 : index
      %135 = vector.load %arg11[%c0_71, %c0_72, %c0_73, %c0_74] : memref<1x1x8x128xf32, #tpu.memory_space<vmem>>, vector<1x1x8x128xf32>
      %136 = vector.shape_cast %135 : vector<1x1x8x128xf32> to vector<8x128xf32>
      %137 = vector.shape_cast %134 : vector<8x128xf32> to vector<1x1x8x128xf32>
      tpu.vector_store %arg11[%c0_71, %c0_72, %c0_73, %c0_74], %137 {strides = array<i32>} : memref<1x1x8x128xf32, #tpu.memory_space<vmem>>, vector<1x1x8x128xf32>,
    } else {
    }
    return
  }
  func.func @transform_0(%arg0: i32, %arg1: i32) -> i32 {
    %c0_i32 = arith.constant 0 : i32
    %c0_i32_0 = arith.constant 0 : i32
    return %c0_i32 : i32
  }
  func.func @transform_1(%arg0: i32, %arg1: i32) -> i32 {
    %c0_i32 = arith.constant 0 : i32
    %c0_i32_0 = arith.constant 0 : i32
    return %c0_i32 : i32
  }
  func.func @transform_2(%arg0: i32, %arg1: i32) -> i32 {
    %c0_i32 = arith.constant 0 : i32
    %c0_i32_0 = arith.constant 0 : i32
    return %c0_i32 : i32
  }
  func.func @transform_3(%arg0: i32, %arg1: i32) -> i32 {
    %c0_i32 = arith.constant 0 : i32
    %c0_i32_0 = arith.constant 0 : i32
    return %c0_i32 : i32
  }
  func.func @transform_4(%arg0: i32, %arg1: i32) -> (i32, i32, i32, i32) {
    %c0_i32 = arith.constant 0 : i32
    %c0_i32_0 = arith.constant 0 : i32
    %c0_i32_1 = arith.constant 0 : i32
    return %arg0, %c0_i32, %arg1, %c0_i32_0 : i32, i32, i32, i32
  }
  func.func @transform_5(%arg0: i32, %arg1: i32) -> (i32, i32, i32, i32) {
    %c0_i32 = arith.constant 0 : i32
    %c0_i32_0 = arith.constant 0 : i32
    %c0_i32_1 = arith.constant 0 : i32
    return %arg0, %c0_i32, %arg1, %c0_i32_0 : i32, i32, i32, i32
  }
  func.func @transform_6(%arg0: i32, %arg1: i32) -> (i32, i32, i32, i32) {
    %c0_i32 = arith.constant 0 : i32
    %c0_i32_0 = arith.constant 0 : i32
    %c0_i32_1 = arith.constant 0 : i32
    return %arg0, %c0_i32, %arg1, %c0_i32_0 : i32, i32, i32, i32
  }
  func.func @transform_7(%arg0: i32, %arg1: i32) -> (i32, i32, i32, i32) {
    %c0_i32 = arith.constant 0 : i32
    %c0_i32_0 = arith.constant 0 : i32
    %c0_i32_1 = arith.constant 0 : i32
    return %arg0, %c0_i32, %arg1, %c0_i32_0 : i32, i32, i32, i32
  }
  func.func @transform_8(%arg0: i32, %arg1: i32) -> (i32, i32, i32, i32) {
    %c0_i32 = arith.constant 0 : i32
    %c0_i32_0 = arith.constant 0 : i32
    %c0_i32_1 = arith.constant 0 : i32
    return %arg0, %c0_i32, %arg1, %c0_i32_0 : i32, i32, i32, i32
  }
  func.func @transform_9(%arg0: i32, %arg1: i32) -> (i32, i32, i32, i32) {
    %c0_i32 = arith.constant 0 : i32
    %c0_i32_0 = arith.constant 0 : i32
    %c0_i32_1 = arith.constant 0 : i32
    return %arg0, %arg1, %c0_i32, %c0_i32_0 : i32, i32, i32, i32
  }
}

</mosaic_0001>

<bundles_post_ra>
// kernel: tpu_custom_call.1
= control target key start
LH: loop header
LB: loop body
LE: loop exit
PB: predicated region body
PF: predicated region fallthrough
CT: control target
= control target key end

     0   :  { %s1987_s0 = inlined_call_operand.vmem [shape: f32[5], index: 0, kind: input, shape index: {}]   ;;  %s1988_s1 = inlined_call_operand.vmem [shape: f32[3], index: 1, kind: input, shape index: {}]   ;;  %s1989_s2 = inlined_call_operand.vmem [shape: f32[5], index: 2, kind: input, shape index: {}]   ;;  %s1990_s3 = inlined_call_operand.<no memory space> [shape: f32[1], index: 3, kind: input, shape index: {}]   ;;  %s1991_s4 = inlined_call_operand.hbm [shape: bf16[2,5,16,128], index: 4, kind: input, shape index: {}]   ;;  %s1992_s5 = inlined_call_operand.hbm [shape: bf16[2,3,16,128], index: 5, kind: input, shape index: {}]   ;;  %s1993_s6 = inlined_call_operand.hbm [shape: bf16[2,3,16,128], index: 6, kind: input, shape index: {}]   ;;  %s1994_s7 = inlined_call_operand.hbm [shape: bf16[2,1,16,128], index: 7, kind: input, shape index: {}]   ;;  %s1995_s8 = inlined_call_operand.hbm [shape: bf16[2,1,16,128], index: 8, kind: input, shape index: {}]   ;;  %s1996_s9 = inlined_call_operand.hbm [shape: f32[2,1,8,128], index: 9, kind: output, shape index: {}]  }
   0x1   :  { %2017 = sst [smem:[#allocation33_spill]] %s1987_s0 }
   0x2   :  { %2018 = sst [smem:[#allocation34_spill]] %s1988_s1 }
   0x3   :  { %2019 = sst [smem:[#allocation35_spill]] %s1989_s2 }
   0x4   :  { %2020 = sst [smem:[#allocation36_spill]] %s1992_s5 }
   0x5   :  { %2021 = sst [smem:[#allocation37_spill]] %s1996_s9 }
   0x6   :  { %14 = sst [smem:[#allocation2]] %s1990_s3 }
   0x7   :  { %15 = vsyncpa [#allocation6], 0 }
   0x8   :  { %16 = vsyncpa [#allocation8], 0 }
   0x9   :  { %17 = vsyncpa [#allocation4], 0 }
   0xa   :  { %19 = vsyncpa [#allocation4 + $0x1], 0 }
   0xb   :  { %20 = vsyncpa [#allocation12], 0 }
   0xc   :  { %22 = vsyncpa [#allocation12 + $0x1], 0 }
   0xd   :  { %23 = vsyncpa [#allocation15], 0 }
   0xe   :  { %25 = vsyncpa [#allocation15 + $0x1], 0 }
   0xf   :  { %26 = vsyncpa [#allocation5], 0 }
  0x10   :  { %28 = vsyncpa [#allocation5 + $0x1], 0  ;;  %s1588_s11 = smov 0   ;;  %s1590_s12 = smov 0  }
  0x11   :  { %s1592_s13 = smov 0   ;;  %s1594_s14 = smov 0  }
  0x12   :  { %s1596_s15 = smov 0   ;;  %s1598_s3 = smov 0  }
  0x13 LB: > { %2022 = sst [smem:[#allocation24_spill]] %s1502_s11  ;;  %s1619_s16 = sadd.s32 4294967295, %s1522_s3   ;;  %s1522_s3 = sphi %s1598_s3, %s34_s3   ;;  %s1518_s15 = sphi %s1596_s15, %s2073_s15   ;;  %s1514_s14 = sphi %s1594_s14, %s2072_s14   ;;  %s1510_s13 = sphi %s1592_s13, %s2070_s13   ;;  %s1506_s12 = sphi %s1590_s12, %s2069_s12   ;;  %s1502_s11 = sphi %s1588_s11, %s2068_s11  }
  0x14   : > { %2023 = sst [smem:[#allocation25_spill]] %s1506_s12  ;;  %s1004_s17 = sadd.s32 4294967294, %s1522_s3  }
  0x15   : > { %2024 = sst [smem:[#allocation26_spill]] %s1510_s13  ;;  %s139_s18 = sadd.s32 1, %s1510_s13 }
  0x16   : > { %2025 = sst [smem:[#allocation27_spill]] %s1514_s14  ;;  %p146_p0 = scmp.ne.s32.totalorder %s1510_s13, %s1506_s12 }
  0x17   : > { %p147_p1 = scmp.eq.s32.totalorder %s1522_s3, 0  ;;  %p152_p2 = scmp.ne.s32.totalorder %s1506_s12, %s1502_s11 }
  0x18   : > { %p1997_p3 = scmp.eq.s32.totalorder %s1619_s16, 0  ;;  %p290_p4 = scmp.eq.s32.totalorder %s1619_s16, 1 }
  0x19   : > { %p1630_p5 = por %p147_p1, %p146_p0  ;;  %p296_p6 = scmp.eq.s32.totalorder %s1004_s17, 1 }
  0x1a   : > { %p1636_p7 = por %p1997_p3, %p152_p2  ;;  %p1640_p8 = por %p290_p4, %p146_p0 }
  0x1b   : > { %p1644_p9 = por %p296_p6, %p152_p2  ;;  %p1005_p10 = scmp.ge.s32.totalorder %s1522_s3, 1 }
  0x1c   : > { %s2027_s20 = scalar_select %p1636_p7, 1, 0 }
  0x1d   : > { %s2029_s21 = scalar_select %p1640_p8, 1, 0 }
  0x1e   : > { %2028 = sst [smem:[#allocation28_spill]] %s2027_s20  ;;  %p303_p11 = scmp.lt.s32.totalorder %s1522_s3, 3 }
  0x1f   : > { %2030 = sst [smem:[#allocation29_spill]] %s2029_s21  ;;  %s46_s27 = sadd.s32 1, %s1518_s15 }
  0x20   : > { %s2031_s22 = scalar_select %p1644_p9, 1, 0 }
  0x21   : > { %s2033_s1 = sld [smem:[#allocation34_spill]]  ;;  %p1653_p12 = pnand %p1005_p10, %p303_p11 }
  0x22   : > { %2032 = sst [smem:[#allocation30_spill]] %s2031_s22  ;;  %p1183_p1 = scmp.lt.s32.totalorder %s1522_s3, 2 }
  0x23   : > { %p1150_p0 = pneg %p1653_p12  ;;  %p1668_p4 = scmp.ge.s32.totalorder %s46_s27, 2 }
  0x24   : > { %s1673_s30 = sand.u32 1, %s1510_s13   ;;  %p1677_p6 = pnand %p1183_p1, %p1630_p5 }
  0x25   : > { %p1664_p2 = pnand %p1150_p0, %p1997_p3 }
  0x27   : > { %s327_s25 = sshll.u32 %s2033_s1, 4  ;;  %p1243_p11 = pneg %p1664_p2  ;;  %s328_s25 = int_to_ptr.vmem [resolvable:$true] %s327_s25 }
  0x28   : > { %s1241_s17 = scalar_lea.vmem %s328_s25, 16  ;;  %p1249_p3 = scmp.lt.s32.totalorder %s328_s25, %s328_s25 }
  0x29   : > { %p1242_p10 = scmp.ne.s32.totalorder %s328_s25, %s1241_s17  ;;  %p1250_p9 = scmp.lt.s32.totalorder %s1241_s17, %s1241_s17 }
  0x2b   : > { %p1244_p0 = pnand %p1243_p11, %p1242_p10  ;;  %p1251_p8 = por %p1250_p9, %p1249_p3 }
  0x2d   : > { %p1245_p13 = pneg %p1244_p0 }
  0x2f   : > { %p1252_p7 = pnand %p1251_p8, %p1245_p13 }
  0x31   : > { %1255 = shalt.err (!%p1252_p7)
}
  0x32   : > { %s1524_s23 = smov [#allocation7]   ;;  %s2075_s27 = smov (%p1668_p4, %s46_s27), 0 }
  0x33   : > { %1156 = dma.vmem_to_smem (!%p1664_p2), %s328_s25, 16, %s1524_s23, [#allocation8]  }
  0x34   : > { %2038 = sst [smem:[#allocation31_spill]] %s2075_s27  ;;  %s134_s19 = ssub.s32 %s1518_s15, %s2075_s27 }
  0x35   : > { %s2009_s24 = sand.u32 1, %s1522_s3   ;;  %p137_p3 = scmp.eq.s32.totalorder %s134_s19, 0 }
  0x36   : > { %s2007_s17 = smul.u32 24, %s1673_s30  ;;  %s1013_s21 = sshll.u32 %s1673_s30, 3 }
  0x37   : > { %s1699_s1 = scalar_select %p137_p3, %s1510_s13, %s139_s18  }
  0x38   : > { %s2008_s22 = smul.u32 384, %s1518_s15  ;;  %s379_s11 = scalar_lea.vmem [#allocation11], %s2007_s17 }
  0x39   : > { %2039 = sst [smem:[#allocation32_spill]] %s1699_s1  ;;  %s388_s9 = sshll.u32 %s379_s11, 4  ;;  %s389_s9 = int_to_ptr.vmem [resolvable:$true] %s388_s9 }
  0x3a   : > { %s2040_s5 = sld [smem:[#allocation36_spill]]  ;;  %s1712_s29 = scalar_lea.sflag [#allocation12], %s2009_s24 }
  0x3b   : > { %p1716_p5 = pneg %p1677_p6  ;;  %s1269_s18 = scalar_lea.vmem %s389_s9, 384 }
  0x3c   : > { %p1270_p7 = scmp.ne.s32.totalorder %s389_s9, %s1269_s18  ;;  %s1525_s11 = smov [#allocation11]  }
  0x3d   : > { %s1274_s19 = sshll.u32 %s1525_s11, 4  ;;  %s1275_s19 = int_to_ptr.vmem [resolvable:$false] %s1274_s19 }
  0x3e   : > { %p1272_p8 = pnand %p1270_p7, %p1716_p5  ;;  %s1276_s14 = scalar_lea.vmem %s1275_s19, 768 }
  0x3f   : > { %p1277_p13 = scmp.lt.s32.totalorder %s389_s9, %s1275_s19  ;;  %p1278_p1 = scmp.lt.s32.totalorder %s1276_s14, %s1269_s18 }
  0x40   : > { %s387_s25 = scalar_lea.hbm %s2040_s5, %s2008_s22  ;;  %p1273_p9 = pneg %p1272_p8 }
  0x41   : > { %p1279_p4 = por %p1278_p1, %p1277_p13 }
  0x43   : > { %p1280_p10 = pnand %p1279_p4, %p1273_p9 }
  0x45   : > { %1283 = shalt.err (!%p1280_p10)
}
  0x46   : > { %s2013_s20 = smov 64   ;;  %s2015_s17 = smov 4  }
  0x47   : > { %1166 = dma.hbm_to_vmem [thread:$0]  (!%p1677_p6), %s387_s25, 384, %s389_s9, %s1712_s29, %s2013_s20, %s2013_s20, %s2015_s17  }
  0x48   : > { %s1056_s11 = sshll.u32 %s1518_s15, 7  ;;  %s425_s14 = scalar_lea.vmem [#allocation14], %s1013_s21 }
  0x49   : > { %s433_s18 = scalar_lea.hbm %s1994_s7, %s1056_s11  ;;  %s434_s24 = sshll.u32 %s425_s14, 4  ;;  %s435_s24 = int_to_ptr.vmem [resolvable:$true] %s434_s24 }
  0x4a   : > { %s2042_s5 = sand.u32 1, %s1522_s3   ;;  %s1297_s1 = scalar_lea.vmem %s435_s24, 128 }
  0x4b   : > { %s1736_s27 = scalar_lea.sflag [#allocation15], %s2042_s5  ;;  %p1298_p0 = scmp.ne.s32.totalorder %s435_s24, %s1297_s1 }
  0x4c   : > { %s1528_s13 = smov [#allocation14]  }
  0x4d   : > { %p1300_p3 = pnand %p1298_p0, %p1716_p5  ;;  %s1302_s12 = sshll.u32 %s1528_s13, 4  ;;  %s1303_s12 = int_to_ptr.vmem [resolvable:$false] %s1302_s12 }
  0x4e   : > { %s1304_s9 = scalar_lea.vmem %s1303_s12, 256  ;;  %p1305_p8 = scmp.lt.s32.totalorder %s435_s24, %s1303_s12 }
  0x4f   : > { %p1301_p7 = pneg %p1300_p3  ;;  %p1306_p9 = scmp.lt.s32.totalorder %s1304_s9, %s1297_s1 }
  0x51   : > { %p1307_p13 = por %p1306_p9, %p1305_p8 }
  0x53   : > { %p1308_p1 = pnand %p1307_p13, %p1301_p7 }
  0x55   : > { %1311 = shalt.err (!%p1308_p1)
}
  0x56   : > { %1172 = dma.hbm_to_vmem [thread:$0]  (!%p1677_p6), %s433_s18, 128, %s435_s24, %s1736_s27, %s2013_s20, %s2013_s20, %s2015_s17  }
  0x57   : > { %s1749_s13 = scalar_lea.hbm %s1995_s8, %s1056_s11  ;;  %s448_s12 = scalar_lea.vmem [#allocation16], %s1013_s21 }
  0x58   : > { %s457_s1 = sshll.u32 %s448_s12, 4  ;;  %s2043_s0 = sld [smem:[#allocation33_spill]]  ;;  %s1753_s1 = int_to_ptr.vmem [resolvable:$true] %s457_s1 }
  0x5e   : > { %s316_s14 = sshll.u32 %s2043_s0, 4  ;;  %s317_s14 = int_to_ptr.vmem [resolvable:$true] %s316_s14 }
  0x5f   : > { %s1312_s9 = scalar_lea.vmem %s317_s14, 16  ;;  %p1320_p3 = scmp.lt.s32.totalorder %s317_s14, %s317_s14 }
  0x60   : > { %p1313_p4 = scmp.ne.s32.totalorder %s317_s14, %s1312_s9  ;;  %p1321_p7 = scmp.lt.s32.totalorder %s1312_s9, %s1312_s9 }
  0x62   : > { %p1315_p10 = pnand %p1313_p4, %p1243_p11  ;;  %p1322_p8 = por %p1321_p7, %p1320_p3 }
  0x64   : > { %p1316_p0 = pneg %p1315_p10 }
  0x66   : > { %p1323_p9 = pnand %p1322_p8, %p1316_p0 }
  0x68   : > { %1326 = shalt.err (!%p1323_p9)
}
  0x69   : > { %s1529_s21 = smov [#allocation3]   ;;  %s2044_s2 = sld [smem:[#allocation35_spill]] }
  0x6a   : > { %1153 = dma.vmem_to_smem (!%p1664_p2), %s317_s14, 16, %s1529_s21, [#allocation6]  }
  0x6f   : > { %s338_s18 = sshll.u32 %s2044_s2, 4  ;;  %s339_s18 = int_to_ptr.vmem [resolvable:$true] %s338_s18 }
  0x70   : > { %s1327_s5 = scalar_lea.vmem %s339_s18, 16  ;;  %p1335_p10 = scmp.lt.s32.totalorder %s339_s18, %s339_s18 }
  0x71   : > { %p1328_p13 = scmp.ne.s32.totalorder %s339_s18, %s1327_s5  ;;  %p1336_p3 = scmp.lt.s32.totalorder %s1327_s5, %s1327_s5 }
  0x73   : > { %p1330_p1 = pnand %p1328_p13, %p1243_p11  ;;  %p1337_p0 = por %p1336_p3, %p1335_p10 }
  0x75   : > { %p1331_p4 = pneg %p1330_p1 }
  0x77   : > { %p1338_p7 = pnand %p1337_p0, %p1331_p4 }
  0x79   : > { %1341 = shalt.err (!%p1338_p7)
}
  0x7a   : > { %s1530_s22 = smov [#allocation9]   ;;  %s1118_s12 = smul.u32 40, %s1673_s30 }
  0x7b   : > { %1159 = dma.vmem_to_smem (!%p1664_p2), %s339_s18, 16, %s1530_s22, [#allocation8]  }
  0x7c   : > { %s1119_s25 = smul.u32 640, %s1518_s15  ;;  %s356_s0 = scalar_lea.vmem [#allocation10], %s1118_s12 }
  0x7d   : > { %s2045_s19 = smul.u32 384, %s1518_s15  ;;  %s365_s2 = sshll.u32 %s356_s0, 4  ;;  %s366_s2 = int_to_ptr.vmem [resolvable:$true] %s365_s2 }
  0x7e   : > { %s2046_s24 = smul.u32 24, %s1673_s30  ;;  %s364_s17 = scalar_lea.hbm %s1991_s4, %s1119_s25 }
  0x7f   : > { %s1778_s21 = scalar_lea.hbm %s1993_s6, %s2045_s19  ;;  %s353_s18 = scalar_lea.sflag [#allocation4], %s1673_s30 }
  0x80   : > { %s402_s11 = scalar_lea.vmem [#allocation13], %s2046_s24  ;;  %s1355_s22 = scalar_lea.vmem %s366_s2, 640 }
  0x81   : > { %s411_s5 = sshll.u32 %s402_s11, 4  ;;  %p1356_p2 = scmp.ne.s32.totalorder %s366_s2, %s1355_s22  ;;  %s1785_s5 = int_to_ptr.vmem [resolvable:$true] %s411_s5 }
  0x82   : > { %s1531_s19 = smov [#allocation10]  }
  0x83   : > { %p1358_p11 = pnand %p1356_p2, %p1716_p5  ;;  %s1360_s14 = sshll.u32 %s1531_s19, 4  ;;  %s1361_s14 = int_to_ptr.vmem [resolvable:$false] %s1360_s14 }
  0x84   : > { %s1362_s9 = scalar_lea.vmem %s1361_s14, 1280  ;;  %p1363_p9 = scmp.lt.s32.totalorder %s366_s2, %s1361_s14 }
  0x85   : > { %p1359_p8 = pneg %p1358_p11  ;;  %p1364_p13 = scmp.lt.s32.totalorder %s1362_s9, %s1355_s22 }
  0x87   : > { %p1365_p1 = por %p1364_p13, %p1363_p9 }
  0x89   : > { %p1366_p4 = pnand %p1365_p1, %p1359_p8 }
  0x8b   : > { %1369 = shalt.err (!%p1366_p4)
}
  0x8c   : > { %s2047_s0 = smov 4   ;;  %s2048_s20 = smov 64  }
  0x8d   : > { %1163 = dma.hbm_to_vmem [thread:$0]  (!%p1677_p6), %s364_s17, 640, %s366_s2, %s353_s18, %s2048_s20, %s2048_s20, %s2047_s0  }
  0x8e   : > { %s1383_s30 = scalar_lea.vmem %s1785_s5, 384  ;;  %s1532_s12 = smov [#allocation13]  }
  0x8f   : > { %p1384_p10 = scmp.ne.s32.totalorder %s1785_s5, %s1383_s30  ;;  %s1388_s25 = sshll.u32 %s1532_s12, 4  ;;  %s1389_s25 = int_to_ptr.vmem [resolvable:$false] %s1388_s25 }
  0x90   : > { %s1390_s24 = scalar_lea.vmem %s1389_s25, 768  ;;  %p1391_p7 = scmp.lt.s32.totalorder %s1785_s5, %s1389_s25 }
  0x91   : > { %p1386_p3 = pnand %p1384_p10, %p1716_p5  ;;  %p1392_p2 = scmp.lt.s32.totalorder %s1390_s24, %s1383_s30 }
  0x93   : > { %p1387_p0 = pneg %p1386_p3  ;;  %p1393_p11 = por %p1392_p2, %p1391_p7 }
  0x95   : > { %p1394_p8 = pnand %p1393_p11, %p1387_p0 }
  0x97   : > { %1397 = shalt.err (!%p1394_p8)
}
  0x98   : > { %1169 = dma.hbm_to_vmem [thread:$0]  (!%p1677_p6), %s1778_s21, 384, %s1785_s5, %s1712_s29, %s2048_s20, %s2048_s20, %s2047_s0  }
  0x99   : > { %s1411_s2 = scalar_lea.vmem %s1753_s1, 128  ;;  %s1533_s17 = smov [#allocation16]  }
  0x9a   : > { %p1412_p9 = scmp.ne.s32.totalorder %s1753_s1, %s1411_s2  ;;  %s1416_s11 = sshll.u32 %s1533_s17, 4  ;;  %s1417_s11 = int_to_ptr.vmem [resolvable:$false] %s1416_s11 }
  0x9b   : > { %s1418_s28 = scalar_lea.vmem %s1417_s11, 256  ;;  %p1419_p4 = scmp.lt.s32.totalorder %s1753_s1, %s1417_s11 }
  0x9c   : > { %p1414_p13 = pnand %p1412_p9, %p1716_p5  ;;  %p1420_p10 = scmp.lt.s32.totalorder %s1418_s28, %s1411_s2 }
  0x9e   : > { %p1415_p1 = pneg %p1414_p13  ;;  %p1421_p3 = por %p1420_p10, %p1419_p4 }
  0xa0   : > { %p1422_p0 = pnand %p1421_p3, %p1415_p1 }
  0xa2   : > { %1425 = shalt.err (!%p1422_p0)
}
  0xa3   : > { %1175 = dma.hbm_to_vmem [thread:$0]  (!%p1677_p6), %s1749_s13, 128, %s1753_s1, %s1736_s27, %s2048_s20, %s2048_s20, %s2047_s0  }
  0xa4   : > { %469 = sbr.rel (%p1653_p12) target bundleno = 250 (0xfa), region = 56  ;;  %p2049_p5 = scmp.eq.s32.totalorder (!%p1653_p12), %s1619_s16, 0 }
  0xa9   : > { %1477 = dma.done.wait (%p2049_p5), [#allocation6], 16   ;;  %p2050_p7 = pmov %p2049_p5 }
  0xaa   : > { %p2051_p2 = pmov %p2049_p5 }
  0xab   : > { %1479 = vsyncadd (%p2050_p7), [#allocation6], 4294967280 }
  0xac   : > { %1481 = dma.done.wait (%p2051_p2), [#allocation8], 32   ;;  %p2052_p11 = pmov %p2051_p2 }
  0xad   : > { %s2053_s10 = sld [smem:[#allocation25_spill]] }
  0xae   : > { %1483 = vsyncadd (%p2052_p11), [#allocation8], 4294967264  ;;  %s2054_s29 = sld [smem:[#allocation28_spill]] }
  0xb3   : > { %s1832_s23 = sand.u32 1, %s2053_s10  }
  0xb4   : > { %s1124_s26 = smul.u32 40, %s1832_s23  ;;  %s484_s27 = scalar_lea.sflag [#allocation4], %s1832_s23 }
  0xb5   : > { %p2055_p12 = scmp.ne.s32.totalorder %s2054_s29, 0 }
  0xb6   : > { %s1836_s13 = scalar_lea.vmem [#allocation10], %s1124_s26 }
  0xb7   : > { %1485 = dma.done.wait (%p2055_p12), %s484_s27, 640  }
  0xb8   : > { %1487 = vsyncadd (%p2055_p12), %s484_s27, 4294966656  ;;  %s492_s1 = sand.u32 1, %s1619_s16   ;;  %s1125_s21 = smul.u32 24, %s1832_s23 }
  0xb9   : > { %s493_s5 = scalar_lea.sflag [#allocation12], %s492_s1 }
  0xba   : > { %s1844_s18 = scalar_lea.vmem [#allocation11], %s1125_s21 }
  0xbb   : > { %1489 = dma.done.wait (%p2055_p12), %s493_s5, 768  }
  0xbc   : > { %1491 = vsyncadd (%p2055_p12), %s493_s5, 4294966528  ;;  %s1851_s22 = sshll.u32 %s1832_s23, 3  ;;  %s1853_s19 = scalar_lea.vmem [#allocation13], %s1125_s21 }
  0xbd   : > { %s511_s14 = scalar_lea.sflag [#allocation15], %s492_s1  ;;  %s514_s9 = scalar_lea.vmem [#allocation14], %s1851_s22 }
  0xbe   : > { %1493 = dma.done.wait (%p2055_p12), %s511_s14, 256  }
  0xbf   : > { %1495 = vsyncadd (%p2055_p12), %s511_s14, 4294967040  ;;  %s523_s16 = scalar_lea.vmem [#allocation16], %s1851_s22 }
  0xc0   : > { %528 = sfence }
  0xc1   : > { %v1059_v0 = vld [vmem:[%s1836_s13] sm:$0xff]   ;;  %s1862_s0 = sld [smem:[#allocation3]]  ;;  %v1110_v1 = vld [vmem:[%s1836_s13 + $0x8] sm:$0xff]   ;;  %v1111_v2 = vld [vmem:[%s1836_s13 + $0x10] sm:$0xff]   ;;  %v758_v18 = vlaneseq  ;;  %s578_s5 = scalar_lea.vmem [#allocation17], %s1851_s22 }
  0xc2   : > { %v1060_v3 = vunpack.c.l.bf16 %v1059_v0  ;;  %v1061_v4 = vunpack.c.h.bf16 %v1059_v0  ;;  %s590_s20 = sld [smem:[#allocation9]]  ;;  %v1064_v5 = vunpack.c.l.bf16 %v1110_v1  ;;  %v1065_v6 = vunpack.c.h.bf16 %v1110_v1  ;;  %v1112_v7 = vld [vmem:[%s1836_s13 + $0x18] sm:$0xff]   ;;  %v1876_v13 = vld [vmem:[%s1836_s13 + $0x20] sm:$0xff]  }
  0xc3   : > { %s1867_s30 = sld [smem:[#allocation3 + $0x1]]  ;;  %v1068_v8 = vunpack.c.l.bf16 %v1111_v2  ;;  %v1069_v9 = vunpack.c.h.bf16 %v1111_v2  ;;  %v1072_v12 = vunpack.c.l.bf16 %v1112_v7  ;;  %v1073_v16 = vunpack.c.h.bf16 %v1112_v7  ;;  %v1079_v17 = vld [vmem:[%s1844_s18] sm:$0xff]   ;;  %v1083_v26 = vld [vmem:[%s1853_s19] sm:$0xff]   ;;  %v1114_v38 = vld [vmem:[%s1844_s18 + $0x8] sm:$0xff]  }
  0xc4   : > { %vm599_vm0 = vcmp.gt.f32.partialorder %v1064_v5, %v1060_v3  ;;  %vm600_vm1 = vcmp.gt.f32.partialorder %v1065_v6, %v1061_v4  ;;  %s1869_s12 = sld [smem:[#allocation9 + $0x1]]  ;;  %v1076_v21 = vunpack.c.l.bf16 %v1876_v13  ;;  %v1077_v22 = vunpack.c.h.bf16 %v1876_v13  ;;  %v1115_v43 = vld [vmem:[%s1853_s19 + $0x8] sm:$0xff]   ;;  %v1116_v1 = vld [vmem:[%s1844_s18 + $0x10] sm:$0xff]   ;;  %s792_s18 = sshll.u32 %s578_s5, 4  ;;  %s793_s18 = int_to_ptr.vmem [resolvable:$true] %s792_s18 }
  0xc5   : > { %v601_v10 = vsel %vm599_vm0, %v1064_v5, %v1060_v3  ;;  %v602_v11 = vsel %vm600_vm1, %v1065_v6, %v1061_v4  ;;  %s1873_s25 = sld [smem:[#allocation3 + $0x2]]  ;;  %v1080_v29 = vunpack.c.l.bf16 %v1079_v17  ;;  %v1081_v30 = vunpack.c.h.bf16 %v1079_v17 }
  0xc6   : > { %vm618_vm2 = vcmp.gt.f32.partialorder %v1068_v8, %v601_v10  ;;  %vm619_vm3 = vcmp.gt.f32.partialorder %v1069_v9, %v602_v11  ;;  %s1878_s24 = sld [smem:[#allocation9 + $0x2]]  ;;  %v1084_v37 = vunpack.c.l.bf16 %v1083_v26  ;;  %v1085_v47 = vunpack.c.h.bf16 %v1083_v26 }
  0xc7   : > { %v589_v14 = vstv %s1862_s0  ;;  %v620_v15 = vsel %vm618_vm2, %v1068_v8, %v601_v10  ;;  %s1882_s2 = sld [smem:[#allocation3 + $0x3]]  ;;  %v621_v20 = vsel %vm619_vm3, %v1069_v9, %v602_v11  ;;  %v1088_v50 = vunpack.c.l.bf16 %v1114_v38  ;;  %s778_s0 = scalar_lea.sflag [#allocation5], %s1832_s23 }
  0xc8   : > { %v591_v19 = vstv %s590_s20  ;;  %s1886_s17 = sld [smem:[#allocation9 + $0x3]]  ;;  %vm637_vm4 = vcmp.gt.f32.partialorder %v1072_v12, %v620_v15  ;;  %vm638_vm5 = vcmp.gt.f32.partialorder %v1073_v16, %v621_v20  ;;  %v1089_v51 = vunpack.c.h.bf16 %v1114_v38  ;;  %s1426_s20 = scalar_lea.vmem %s793_s18, 128 }
  0xc9   : > { %v592_v23 = vmul.f32 %v1060_v3, %v591_v19  ;;  %v593_v24 = vmul.f32 %v1061_v4, %v591_v19  ;;  %v604_v25 = vstv %s1867_s30  ;;  %s1891_s11 = sld [smem:[#allocation3 + $0x4]]  ;;  %v639_v36 = vsel %vm637_vm4, %v1072_v12, %v620_v15  ;;  %p1427_p6 = scmp.ne.s32.totalorder %s793_s18, %s1426_s20 }
  0xca   : > { %v605_v27 = vsel %vm599_vm0, %v604_v25, %v589_v14  ;;  %v608_v28 = vstv %s1869_s12  ;;  %s1896_s28 = sld [smem:[#allocation9 + $0x4]]  ;;  %v606_v31 = vsel %vm600_vm1, %v604_v25, %v589_v14  ;;  %v640_v48 = vsel %vm638_vm5, %v1073_v16, %v621_v20  ;;  %s1534_s30 = smov [#allocation17]  }
  0xcb   : > { %v609_v32 = vmul.f32 %v1064_v5, %v608_v28  ;;  %v610_v33 = vmul.f32 %v1065_v6, %v608_v28  ;;  %v623_v34 = vstv %s1873_s25  ;;  %s1900_s10 = sld [smem:[#allocation7]]  ;;  %vm1913_vm6 = vcmp.gt.f32.partialorder %v1076_v21, %v639_v36  ;;  %v1117_v6 = vld [vmem:[%s1853_s19 + $0x10] sm:$0xff]   ;;  %s1430_s12 = sshll.u32 %s1534_s30, 4  ;;  %s1431_s12 = int_to_ptr.vmem [resolvable:$false] %s1430_s12 }
  0xcc   : > { %v627_v35 = vstv %s1878_s24  ;;  %s1042_s29 = sld [smem:[#allocation7 + $0x1]]  ;;  %v624_v44 = vsel %vm618_vm2, %v623_v34, %v605_v27  ;;  %v625_v45 = vsel %vm619_vm3, %v623_v34, %v606_v31  ;;  %v1092_v54 = vunpack.c.l.bf16 %v1115_v43  ;;  %s1432_s25 = scalar_lea.vmem %s1431_s12, 256 }
  0xcd   : > { %v611_v39 = vadd.f32 %v609_v32, %v592_v23  ;;  %v612_v40 = vadd.f32 %v610_v33, %v593_v24  ;;  %v628_v41 = vmul.f32 %v1068_v8, %v627_v35  ;;  %v629_v42 = vmul.f32 %v1069_v9, %v627_v35  ;;  %s1909_s26 = sld [smem:[#allocation7 + $0x2]]  ;;  %v1107_v24 = vld [vmem:[%s523_s16] sm:$0xff]   ;;  %p1433_p1 = scmp.lt.s32.totalorder %s793_s18, %s1431_s12 }
  0xce   : > { %v642_v46 = vstv %s1882_s2  ;;  %v646_v49 = vstv %s1886_s17  ;;  %v1093_v55 = vunpack.c.h.bf16 %v1115_v43  ;;  %vm1922_vm7 = vcmp.gt.f32.partialorder %v1077_v22, %v640_v48  ;;  %s1935_s27 = sld [smem:[#allocation2]]  ;;  %p1434_p4 = scmp.lt.s32.totalorder %s1432_s25, %s1426_s20 }
  0xcf   : > { %v630_v52 = vadd.f32 %v628_v41, %v611_v39  ;;  %v631_v56 = vadd.f32 %v629_v42, %v612_v40  ;;  %v643_v57 = vsel %vm637_vm4, %v642_v46, %v624_v44  ;;  %v644_v58 = vsel %vm638_vm5, %v642_v46, %v625_v45  ;;  %s2060_s13 = sld [smem:[#allocation27_spill]] }
  0xd0   : > { %v663_v59 = vstv %s1896_s28  ;;  %v647_v60 = vmul.f32 %v1072_v12, %v646_v49  ;;  %v648_v61 = vmul.f32 %v1073_v16, %v646_v49  ;;  %v659_v7 = vstv %s1891_s11  ;;  %v1103_v16 = vld [vmem:[%s514_s9] sm:$0xff]   ;;  %s2061_s1 = sld [smem:[#allocation29_spill]]  ;;  %p1435_p10 = por %p1434_p4, %p1433_p1 }
  0xd1   : > { %v673_v63 = vstv %s1900_s10  ;;  %v664_v8 = vmul.f32 %v1076_v21, %v663_v59  ;;  %v1096_v14 = vunpack.c.l.bf16 %v1116_v1  ;;  %v1097_v15 = vunpack.c.h.bf16 %v1116_v1  ;;  %s2062_s9 = sld [smem:[#allocation37_spill]] }
  0xd2   : > { %v688_v0 = vstv %s1042_s29  ;;  %v674_v2 = vmul.f32 %v1080_v29, %v673_v63  ;;  %v675_v3 = vmul.f32 %v1081_v30, %v673_v63  ;;  %v680_v4 = vmul.f32 %v1084_v37, %v673_v63 }
  0xd3   : > { %v681_v5 = vmul.f32 %v1085_v47, %v673_v63  ;;  %v689_v9 = vmul.f32 %v1088_v50, %v688_v0  ;;  %v690_v10 = vmul.f32 %v1089_v51, %v688_v0  ;;  %v698_v11 = vmul.f32 %v1092_v54, %v688_v0 }
  0xd4   : > { %v699_v12 = vmul.f32 %v1093_v55, %v688_v0  ;;  %v708_v20 = vstv %s1909_s26  ;;  %v1100_v23 = vunpack.c.l.bf16 %v1117_v6  ;;  %v1101_v29 = vunpack.c.h.bf16 %v1117_v6 }
  0xd5   : > { %v691_v17 = vadd.f32 %v689_v9, %v674_v2  ;;  %v692_v19 = vadd.f32 %v690_v10, %v675_v3  ;;  %v700_v25 = vadd.f32 %v698_v11, %v680_v4  ;;  %v709_v27 = vmul.f32 %v1096_v14, %v708_v20  ;;  %s1053_s21 = sshll.u32 %s2060_s13, 7 }
  0xd6   : > { %v701_v26 = vadd.f32 %v699_v12, %v681_v5  ;;  %v710_v28 = vmul.f32 %v1097_v15, %v708_v20  ;;  %v718_v21 = vmul.f32 %v1100_v23, %v708_v20  ;;  %v1104_v30 = vunpack.c.l.bf16 %v1103_v16  ;;  %p2063_p8 = scmp.ne.s32.totalorder %s2061_s1, 0 }
  0xd7   : > { %v1105_v31 = vunpack.c.h.bf16 %v1103_v16  ;;  %v649_v32 = vadd.f32 %v647_v60, %v630_v52  ;;  %v711_v33 = vadd.f32 %v709_v27, %v691_v17  ;;  %v1108_v34 = vunpack.c.l.bf16 %v1107_v24  ;;  %s790_s16 = scalar_lea.hbm %s2062_s9, %s1053_s21 }
  0xd8   : > { %v1109_v35 = vunpack.c.h.bf16 %v1107_v24  ;;  %v712_v36 = vadd.f32 %v710_v28, %v692_v19  ;;  %v719_v37 = vmul.f32 %v1101_v29, %v708_v20  ;;  %v720_v38 = vadd.f32 %v718_v21, %v700_v25  ;;  %p1428_p9 = pnand %p1427_p6, %p2063_p8 }
  0xd9   : > { %v759_v39 = vshrl.u32 %v758_v18, 7  ;;  %v660_v40 = vsel %vm1913_vm6, %v659_v7, %v643_v57  ;;  %v665_v41 = vmul.f32 %v1077_v22, %v663_v59  ;;  %v742_v42 = vsub.f32 %v1104_v30, %v1108_v34 }
  0xda   : > { %v650_v43 = vadd.f32 %v648_v61, %v631_v56  ;;  %v721_v44 = vadd.f32 %v719_v37, %v701_v26  ;;  %v730_v45 = vsub.f32 %v711_v33, %v720_v38  ;;  %v743_v46 = vsub.f32 %v1105_v31, %v1109_v35  ;;  %p1429_p13 = pneg %p1428_p9 }
  0xdb   : > { %v661_v47 = vsel %vm1922_vm7, %v659_v7, %v644_v58  ;;  %v760_v48 = vadd.s32 8, %v759_v39  ;;  %v666_v49 = vadd.f32 %v664_v8, %v649_v32  ;;  %v744_v52 = vmul.f32 %v742_v42, %v660_v40 }
  0xdc   : > { %v731_v50 = vsub.f32 %v712_v36, %v721_v44  ;;  %v732_v51 = vmul.f32 %v730_v45, %v660_v40  ;;  %v762_v53 = vand.u32 127, %v758_v18  ;;  %v767_v54 = vmul.u32 128, %v759_v39  ;;  %p1436_p3 = pnand %p1435_p10, %p1429_p13 }
  0xdd   : > { %v667_v55 = vadd.f32 %v665_v41, %v650_v43  ;;  %v745_v57 = vmul.f32 %v743_v46, %v661_v47  ;;  %v739_v56 = vstv %s1935_s27  ;;  %v768_v59 = vmul.u32 128, %v760_v48 }
  0xde   : > { %v733_v13 = vmul.f32 %v731_v50, %v661_v47  ;;  %v734_v22 = vadd.f32 %v732_v51, %v720_v38  ;;  %v746_v62 = vadd.f32 %v1108_v34, %v744_v52  ;;  %v769_v58 = vadd.s32 %v767_v54, %v762_v53 }
  0xdf   : > { %v747_v1 = vadd.f32 %v1109_v35, %v745_v57  ;;  %v770_v2 = vadd.s32 %v768_v59, %v762_v53 }
  0xe0   : > { %v735_v60 = vadd.f32 %v733_v13, %v721_v44  ;;  %v736_v61 = vadd.f32 %v734_v22, %v666_v49  ;;  %vm771_vm8 = vcmp.lt.s32.totalorder %v769_v58, 256 }
  0xe1   : > { %vm772_vm9 = vcmp.lt.s32.totalorder %v770_v2, 256 }
  0xe2   : > { %v737_v63 = vadd.f32 %v735_v60, %v667_v55  ;;  %v740_v0 = vadd.f32 %v739_v56, %v736_v61 }
  0xe4   : > { %v741_v3 = vadd.f32 %v739_v56, %v737_v63  ;;  %v748_v18 = vsub.f32 %v740_v0, %v746_v62 }
  0xe6   : > { %v749_v4 = vsub.f32 %v741_v3, %v747_v1  ;;  %v750_v5 = vmul.f32 %v748_v18, %v748_v18 }
  0xe8   : > { %v751_v6 = vmul.f32 %v749_v4, %v749_v4  ;;  %v773_v7 = vsel %vm771_vm8, %v750_v5, 0.0 }
  0xea   : > { %v774_v8 = vsel %vm772_vm9, %v751_v6, 0.0 }
  0xeb   : > { %v775_v9 = vadd.f32 %v774_v8, %v773_v7 }
  0xed   : > { %776 = vst [vmem:[%s578_s5] sm:$0xff] %v775_v9 }
  0xee   : > { %1439 = shalt.err (!%p1436_p3)
}
  0xef   : > { %s1440_s22 = scalar_lea.hbm %s790_s16, 128  ;;  %s1444_s2 = scalar_lea.hbm %s2062_s9, 256 }
  0xf0   : > { %p1441_p0 = scmp.ne.s32.totalorder %s790_s16, %s1440_s22  ;;  %p1445_p2 = scmp.lt.s32.totalorder %s790_s16, %s2062_s9 }
  0xf1   : > { %p1446_p11 = scmp.lt.s32.totalorder %s1444_s2, %s1440_s22 }
  0xf2   : > { %p1442_p5 = pnand %p1441_p0, %p2063_p8 }
  0xf3   : > { %p1447_p12 = por %p1446_p11, %p1445_p2 }
  0xf4   : > { %p1443_p7 = pneg %p1442_p5 }
  0xf6   : > { %p1448_p6 = pnand %p1447_p12, %p1443_p7 }
  0xf8   : > { %1451 = shalt.err (!%p1448_p6)
}
  0xf9   : > { %1148 = dma.vmem_to_hbm [thread:$0]  (%p2063_p8), %s793_s18, 128, %s790_s16, %s778_s0  }
  0xfa PF: > { %s2064_s28 = sld [smem:[#allocation24_spill]]  ;;  %p2067_p13 = scmp.ge.s32.totalorder %s1522_s3, 2 }
  0xfb   : > { %s2065_s10 = sld [smem:[#allocation30_spill]] }
 0x100   : > { %s804_s29 = sand.u32 1, %s2064_s28  }
 0x101   : > { %p2066_p9 = scmp.ne.s32.totalorder %s2065_s10, 0  ;;  %s805_s26 = scalar_lea.sflag [#allocation5], %s804_s29 }
 0x103   : > { %p1177_p1 = pnand %p2067_p13, %p2066_p9 }
 0x105   : > { %p1178_p4 = pneg %p1177_p1 }
 0x107   : > { %1497 = dma.done.wait (%p1178_p4), %s805_s26, 128  }
 0x108   : > { %1499 = vsyncadd (%p1178_p4), %s805_s26, 4294967168  ;;  %s34_s3 = sadd.s32 1, %s1522_s3   ;;  %s2068_s11 = sld [smem:[#allocation25_spill]] }
 0x109   : > { %p31_p10 = scmp.ge.s32.totalorder %s34_s3, 4   ;;  %s2069_s12 = sld [smem:[#allocation26_spill]] }
 0x10a   : > { %s2070_s13 = sld [smem:[#allocation32_spill]]  ;;  %s2072_s14 = smov %s1518_s15 }
 0x10b   : > { %s2071_s27 = sld [smem:[#allocation31_spill]] }
 0x10d   :  { %33 = sbr.rel (!%p31_p10) target bundleno = 19 (0x13), region = 174 }
 0x111   : > { %s2073_s15 = smov %s2071_s27 }
 0x112   :  { %810 = vsyncpa [#allocation4], 1 }
 0x113   :  { %812 = vsyncpa [#allocation4 + $0x1], 1 }
 0x114   :  { %813 = vsyncpa [#allocation12], 1 }
 0x115   :  { %815 = vsyncpa [#allocation12 + $0x1], 1 }
 0x116   :  { %816 = vsyncpa [#allocation15], 1 }
 0x117   :  { %818 = vsyncpa [#allocation15 + $0x1], 1 }
 0x118   :  { %819 = vsyncpa [#allocation5], 1 }
 0x119   :  { %821 = vsyncpa [#allocation5 + $0x1], 1 }
 0x11a   :  { %822 = vsyncpa [#allocation6], 1 }
 0x11b   :  { %824 = vsyncpa [#allocation6 + $0x1], 1 }
 0x11c   :  { %825 = vsyncpa [#allocation8], 1 }

</bundles_post_ra>
